<compile_context>
chip_gen: v5e
topology: v5e:2x2
jax: 0.10.0
libtpu: 0.0.40
codegen_flags: <defaults>
</compile_context>

<pallas_src>
import functools

import jax
import jax.numpy as jnp
from jax import lax
from jax.experimental import pallas as pl
from jax.experimental.pallas import tpu as pltpu


def _round_up(x: int, m: int) -> int:
    return (x + m - 1) // m * m


def _sublane_align(dtype) -> int:
    # 8 rows for f32, 16 for bf16, 32 for int8/fp8 (packed sublane layouts).
    return max(8, 32 // jnp.dtype(dtype).itemsize)


def _vmem_capacity_bytes() -> int:
    try:
        cap = int(pltpu.get_tpu_info().vmem_capacity_bytes)
        if cap > 0:
            return cap
    except Exception:
        pass
    return 64 * 1024 * 1024  # conservative fallback: v7x per-TensorCore VMEM


def _choose_tiles(M, D, O, x_item, w_item, out_item, comp_item,
                  budget, tm_cap, tn_cap, m_align):
    """Pick (tm, tn) under the VMEM budget.

    Tiles do NOT need to divide M / O (grid is pl.cdiv-sized; boundary blocks are
    masked by Pallas) -- only hardware alignment is enforced.
    """
    if O < 128:
        tn = O                       # full-extent last dim (only legal sub-128 choice)
        tn_floor = O
    else:
        tn_cap_eff = max(128, (tn_cap // 128) * 128)
        tn = min(_round_up(O, 128), tn_cap_eff)
        tn_floor = 128

    tm_cap_eff = max(m_align, (tm_cap // m_align) * m_align)
    tm = min(_round_up(M, m_align), tm_cap_eff)
    tm_floor = m_align

    def need(tm_, tn_):
        # double-buffered x / w / out tiles + transposed-weight VMEM scratch
        return (2 * (x_item * tm_ * D + w_item * tn_ * D + out_item * tm_ * tn_)
                + comp_item * D * tn_)

    # Prefer shrinking tm first (keeps tn large -> fewer x re-streams), then tn.
    while need(tm, tn) > budget:
        if tm > max(tm_floor, 256):
            tm = max(tm_floor, _round_up(tm // 2, m_align))
        elif tn > tn_floor:
            tn = max(tn_floor, _round_up(tn // 2, 128))
        elif tm > tm_floor:
            tm = max(tm_floor, _round_up(tm // 2, m_align))
        else:
            # TODO(synk): K-split (tk grid axis + f32 VMEM accumulator) for huge D.
            break

    return tm, tn, need(tm, tn)


def _linear_kernel(x_ref, w_ref, o_ref, *, compute_dtype):
    # x_ref: [tm, D], w_ref: [tn, D] (PyTorch layout).  Contract on the shared D
    # axis; the MXU consumes the transposed RHS via dot_general dimension numbers.
    x = x_ref[...].astype(compute_dtype)
    w = w_ref[...].astype(compute_dtype)
    o_ref[...] = lax.dot_general(
        x, w,
        dimension_numbers=(((1,), (1,)), ((), ())),
        preferred_element_type=jnp.float32,
    ).astype(o_ref.dtype)


def _linear_kernel_wres(x_ref, w_ref, o_ref, wt_ref, *, compute_dtype):
    # Weight-resident (N-outer) variant: the (tn, D) weight tile stays in VMEM for
    # the whole inner M sweep, so transpose + cast it ONCE per outer step into the
    # wt_ref scratch instead of re-doing that work every inner iteration.
    @pl.when(pl.program_id(1) == 0)
    def _():
        wt_ref[...] = jnp.transpose(w_ref[...]).astype(compute_dtype)

    x = x_ref[...].astype(compute_dtype)
    o_ref[...] = jnp.dot(
        x, wt_ref[...], preferred_element_type=jnp.float32
    ).astype(o_ref.dtype)


@functools.partial(jax.jit, static_argnames=("compute_dtype", "tm_cap", "tn_cap"))
def decoder_forward(z, weight, *, compute_dtype=None, tm_cap=1024, tn_cap=2048):
    """z: [B, T, D], weight: [output_dim, D] (PyTorch nn.Linear layout).

    Returns [B*T, output_dim], matching `self.get_output(z.view(-1, D))`.
    """
    B, T, D = z.shape
    O, Dw = weight.shape
    assert Dw == D, "weight input_dim must match z's last dim"
    M = B * T
    x = z.reshape(M, D)  # torch .view(-1, D)

    out_dtype = jnp.promote_types(z.dtype, weight.dtype)
    comp_dtype = jnp.dtype(compute_dtype) if compute_dtype is not None else jnp.dtype(out_dtype)

    x_item = jnp.dtype(z.dtype).itemsize
    w_item = jnp.dtype(weight.dtype).itemsize
    out_item = jnp.dtype(out_dtype).itemsize
    comp_item = jnp.dtype(comp_dtype).itemsize

    m_align = max(_sublane_align(z.dtype), _sublane_align(out_dtype))

    cap = _vmem_capacity_bytes()
    budget = min(int(cap * 0.7), 96 * 1024 * 1024)

    tm, tn, vmem_need = _choose_tiles(
        M, D, O, x_item, w_item, out_item, comp_item,
        budget, tm_cap, tn_cap, m_align)

    m_tiles = pl.cdiv(M, tm)
    n_tiles = pl.cdiv(O, tn)

    # Adaptive loop order: the tensor whose re-streaming would cost more HBM bytes
    # is indexed only by the OUTER grid axis (DMA'd once per outer step).
    wres_bytes = n_tiles * M * D * x_item + O * D * w_item   # weight resident (N outer)
    xres_bytes = M * D * x_item + m_tiles * O * D * w_item   # x resident (M outer)
    weight_resident = wres_bytes <= xres_bytes

    if weight_resident:
        grid = (n_tiles, m_tiles)                    # N outer, M inner
        x_map = lambda j, i: (i, 0)
        w_map = lambda j, i: (j, 0)
        o_map = lambda j, i: (i, j)
        bytes_read = wres_bytes
    else:
        grid = (m_tiles, n_tiles)                    # M outer, N inner
        x_map = lambda i, j: (i, 0)
        w_map = lambda i, j: (j, 0)
        o_map = lambda i, j: (i, j)
        bytes_read = xres_bytes

    # Hoisted transpose only pays off when the weight tile is revisited (>1 inner step).
    use_wres_kernel = weight_resident and m_tiles > 1
    if use_wres_kernel:
        kernel = functools.partial(_linear_kernel_wres, compute_dtype=comp_dtype)
        scratch_shapes = [pltpu.VMEM((D, tn), comp_dtype)]
    else:
        kernel = functools.partial(_linear_kernel, compute_dtype=comp_dtype)
        scratch_shapes = []

    cost = pl.CostEstimate(
        flops=2 * M * D * O,
        transcendentals=0,
        bytes_accessed=int(bytes_read + M * O * out_item),
    )

    vmem_limit = min(int(cap * 0.9), max(vmem_need + (8 << 20), 32 << 20))

    out = pl.pallas_call(
        kernel,
        out_shape=jax.ShapeDtypeStruct((M, O), out_dtype),
        grid_spec=pltpu.PrefetchScalarGridSpec(
            num_scalar_prefetch=0,
            grid=grid,
            in_specs=[
                pl.BlockSpec((tm, D), x_map),   # activation rows
                pl.BlockSpec((tn, D), w_map),   # weight tile (PyTorch [O, D] layout)
            ],
            out_specs=pl.BlockSpec((tm, tn), o_map),
            scratch_shapes=scratch_shapes,
        ),
        compiler_params=pltpu.CompilerParams(
            # Only the outer (resident-tensor) axis is sharded across TensorCores on
            # v7x; sharding the inner axis would double the resident tensor's HBM
            # traffic.  No-op on single-TC v5e/v6e.
            dimension_semantics=("parallel", "arbitrary"),
            vmem_limit_bytes=int(vmem_limit),
        ),
        cost_estimate=cost,
    )(x, weight)

    return out


def init_decoder_params(key, input_dim, output_dim, dtype=jnp.float32):
    # Mimics nn.Linear default init: U(-1/sqrt(fan_in), 1/sqrt(fan_in)).
    bound = 1.0 / (input_dim ** 0.5)
    return jax.random.uniform(
        key, (output_dim, input_dim), dtype=dtype, minval=-bound, maxval=bound
    )


def _reference(z, weight):
    return jnp.dot(z.reshape(-1, z.shape[-1]).astype(jnp.float32),
                   weight.T.astype(jnp.float32),
                   precision=lax.Precision.HIGHEST)


if __name__ == "__main__":
    key = jax.random.PRNGKey(0)
    ks = jax.random.split(key, 12)

    # Case 1: tiny shapes; exercises row (M=14) and output-dim (O=200) boundary
    # masking with a single (16, 256) block.
    B, T, D, O = 2, 7, 32, 200
    z1 = jax.random.normal(ks[0], (B, T, D), dtype=jnp.float32)
    w1 = init_decoder_params(ks[1], D, O)
    o1 = jax.block_until_ready(decoder_forward(z1, w1))
    assert o1.shape == (B * T, O)
    assert jnp.allclose(o1, _reference(z1, w1), atol=2e-4, rtol=2e-4)

    # Case 2: whole problem fits in one tile (tm=600, tn=1024) -> minimal HBM traffic.
    B2, T2, D2, O2 = 2, 300, 64, 1000
    z2 = jax.random.normal(ks[2], (B2, T2, D2), dtype=jnp.float32)
    w2 = init_decoder_params(ks[3], D2, O2)
    o2 = jax.block_until_ready(decoder_forward(z2, w2))
    assert o2.shape == (B2 * T2, O2)
    assert jnp.allclose(o2, _reference(z2, w2), atol=2e-4, rtol=2e-4)

    # Case 3: forced small tiles -> weight-resident multi-tile grid (3x3), boundary
    # M block, hoisted-transpose kernel path.
    B3, T3, D3, O3 = 2, 150, 64, 384
    z3 = jax.random.normal(ks[4], (B3, T3, D3), dtype=jnp.float32)
    w3 = init_decoder_params(ks[5], D3, O3)
    o3 = jax.block_until_ready(decoder_forward(z3, w3, tm_cap=128, tn_cap=128))
    assert o3.shape == (B3 * T3, O3)
    assert jnp.allclose(o3, _reference(z3, w3), atol=2e-4, rtol=2e-4)

    # Case 3b: same shapes with bf16 compute (hoisted transpose + cast path).
    o3b = jax.block_until_ready(
        decoder_forward(z3, w3, compute_dtype=jnp.bfloat16, tm_cap=128, tn_cap=128))
    assert jnp.allclose(o3b, _reference(z3, w3), atol=5e-2, rtol=5e-2)

    # Case 4: forced x-resident (M-outer) order: m_tiles=1, n_tiles=2.
    B4, T4, D4, O4 = 4, 128, 64, 256
    z4 = jax.random.normal(ks[6], (B4, T4, D4), dtype=jnp.float32)
    w4 = init_decoder_params(ks[7], D4, O4)
    o4 = jax.block_until_ready(decoder_forward(z4, w4, tm_cap=512, tn_cap=128))
    assert o4.shape == (B4 * T4, O4)
    assert jnp.allclose(o4, _reference(z4, w4), atol=2e-4, rtol=2e-4)

    # Case 5: bf16 compute path on f32 inputs (f32 accumulation), loose tolerance.
    o5 = jax.block_until_ready(decoder_forward(z2, w2, compute_dtype=jnp.bfloat16))
    assert jnp.allclose(o5, _reference(z2, w2), atol=5e-2, rtol=5e-2)

    # Case 6: bf16 inputs + bf16 weights (dtype-aware 16-row sublane alignment).
    B6, T6, D6, O6 = 2, 8, 64, 256
    z6 = jax.random.normal(ks[8], (B6, T6, D6), dtype=jnp.bfloat16)
    w6 = init_decoder_params(ks[9], D6, O6, dtype=jnp.bfloat16)
    o6 = jax.block_until_ready(decoder_forward(z6, w6))
    assert o6.shape == (B6 * T6, O6)
    assert jnp.allclose(o6.astype(jnp.float32), _reference(z6, w6),
                        atol=5e-2, rtol=5e-2)

    print("KERNEL_OK")
</pallas_src>

<mosaic_0001>
module attributes {stable_mosaic.version = 11 : i64} {
  func.func @_linear_kernel(%arg0: i32, %arg1: i32, %arg2: memref<16x32xf32, #tpu.memory_space<vmem>>, %arg3: memref<256x32xf32, #tpu.memory_space<vmem>>, %arg4: memref<16x256xf32, #tpu.memory_space<vmem>>) attributes {dimension_semantics = [#tpu.dimension_semantics<parallel>, #tpu.dimension_semantics<arbitrary>], iteration_bounds = array<i64: 1, 1>, scalar_prefetch = 0 : i64, scratch_operands = 0 : i64, tpu.core_type = #tpu.core_type<tc>, window_params = [{transform_indices = @transform_0, window_bounds = array<i64: 16, 32>}, {transform_indices = @transform_1, window_bounds = array<i64: 256, 32>}, {transform_indices = @transform_2, window_bounds = array<i64: 16, 256>}]} {
    %c0 = arith.constant 0 : index
    %c0_0 = arith.constant 0 : index
    %0 = vector.load %arg2[%c0, %c0_0] : memref<16x32xf32, #tpu.memory_space<vmem>>, vector<16x32xf32>
    %c0_1 = arith.constant 0 : index
    %c0_2 = arith.constant 0 : index
    %1 = vector.load %arg3[%c0_1, %c0_2] : memref<256x32xf32, #tpu.memory_space<vmem>>, vector<256x32xf32>
    %cst = arith.constant dense<0.000000e+00> : vector<16x256xf32>
    %2 = tpu.matmul %0, %1, %cst {dimension_numbers = #tpu.dot_dimension_numbers<[1], [1], [0], [0], [0, 0, 1, 0], [], []>} : vector<16x32xf32>, vector<256x32xf32>, vector<16x256xf32> -> vector<16x256xf32>
    %c0_3 = arith.constant 0 : index
    %c0_4 = arith.constant 0 : index
    %3 = vector.load %arg4[%c0_3, %c0_4] : memref<16x256xf32, #tpu.memory_space<vmem>>, vector<16x256xf32>
    tpu.vector_store %arg4[%c0_3, %c0_4], %2 {strides = array<i32>} : memref<16x256xf32, #tpu.memory_space<vmem>>, vector<16x256xf32>,
    return
  }
  func.func @transform_0(%arg0: i32, %arg1: i32) -> (i32, i32) {
    %c0_i32 = arith.constant 0 : i32
    %c0_i32_0 = arith.constant 0 : i32
    return %arg1, %c0_i32 : i32, i32
  }
  func.func @transform_1(%arg0: i32, %arg1: i32) -> (i32, i32) {
    %c0_i32 = arith.constant 0 : i32
    %c0_i32_0 = arith.constant 0 : i32
    return %arg0, %c0_i32 : i32, i32
  }
  func.func @transform_2(%arg0: i32, %arg1: i32) -> (i32, i32) {
    %c0_i32 = arith.constant 0 : i32
    return %arg1, %arg0 : i32, i32
  }
}

</mosaic_0001>

<bundles_post_ra>
// kernel: decoder_forward.1
= control target key start
LH: loop header
LB: loop body
LE: loop exit
PB: predicated region body
PF: predicated region fallthrough
CT: control target
= control target key end

     0   :  { %vm46_vm0 = vcmask 261120   ;;  %s505_s0 = inlined_call_operand.vmem [shape: f32[14,32], index: 0, kind: input, shape index: {}]   ;;  %s506_s1 = inlined_call_operand.vmem [shape: f32[200,32], index: 1, kind: input, shape index: {}]   ;;  %s507_s2 = inlined_call_operand.hbm [shape: f32[14,200], index: 2, kind: output, shape index: {}]  }
   0x1   :  { %v29_v0 = vld [vmem:[%s506_s1 + $0x78] sm:$0xff]  ;;  %v28_v2 = vld [vmem:[%s506_s1 + $0x70] sm:$0xff]  ;;  %v27_v4 = vld [vmem:[%s506_s1 + $0x68] sm:$0xff] }
   0x2   :  { %v45_v1 = vld [vmem:[%s506_s1 + $0xf8] sm:$0xff]  ;;  %253 = vmatpush.xpose.msk.msra.mxu2 %vm46_vm0, %v29_v0  ;;  %v44_v3 = vld [vmem:[%s506_s1 + $0xf0] sm:$0xff]  ;;  %217 = vmatpush.xpose.msk.msra.mxu0 %vm46_vm0, %v29_v0  ;;  %v43_v5 = vld [vmem:[%s506_s1 + $0xe8] sm:$0xff] }
   0x3   :  { %269 = vmatpush.xpose.msk.msra.mxu3 %vm46_vm0, %v45_v1  ;;  %235 = vmatpush.xpose.msk.msra.mxu1 %vm46_vm0, %v45_v1 }
   0x6   :  { %254 = vmatpush.xpose.msk.msra.mxu2 %vm46_vm0, %v28_v2  ;;  %218 = vmatpush.xpose.msk.msra.mxu0 %vm46_vm0, %v28_v2 }
   0x7   :  { %270 = vmatpush.xpose.msk.msra.mxu3 %vm46_vm0, %v44_v3  ;;  %236 = vmatpush.xpose.msk.msra.mxu1 %vm46_vm0, %v44_v3 }
   0x8   :  { %7 = vsyncpa [#allocation3], 0  ;;  %v26_v6 = vld [vmem:[%s506_s1 + $0x60] sm:$0xff]  ;;  %v25_v8 = vld [vmem:[%s506_s1 + $0x58] sm:$0xff]  ;;  %s205_s24 = sshll.u32 %s507_s2, 4  ;;  %s316_s25 = smov 16   ;;  %s206_s24 = int_to_ptr.hbm [resolvable:$true] %s205_s24 }
   0x9   :  { %v42_v7 = vld [vmem:[%s506_s1 + $0xe0] sm:$0xff]  ;;  %v41_v9 = vld [vmem:[%s506_s1 + $0xd8] sm:$0xff]  ;;  %v24_v10 = vld [vmem:[%s506_s1 + $0x50] sm:$0xff] }
   0xa   :  { %255 = vmatpush.xpose.msk.msra.mxu2 %vm46_vm0, %v27_v4  ;;  %219 = vmatpush.xpose.msk.msra.mxu0 %vm46_vm0, %v27_v4  ;;  %v40_v11 = vld [vmem:[%s506_s1 + $0xd0] sm:$0xff]  ;;  %v23_v12 = vld [vmem:[%s506_s1 + $0x48] sm:$0xff]  ;;  %v22_v14 = vld [vmem:[%s506_s1 + $0x40] sm:$0xff] }
   0xb   :  { %271 = vmatpush.xpose.msk.msra.mxu3 %vm46_vm0, %v43_v5  ;;  %237 = vmatpush.xpose.msk.msra.mxu1 %vm46_vm0, %v43_v5  ;;  %v39_v13 = vld [vmem:[%s506_s1 + $0xc8] sm:$0xff]  ;;  %v38_v15 = vld [vmem:[%s506_s1 + $0xc0] sm:$0xff]  ;;  %v21_v16 = vld [vmem:[%s506_s1 + $0x38] sm:$0xff] }
   0xc   :  { %v37_v17 = vld [vmem:[%s506_s1 + $0xb8] sm:$0xff]  ;;  %v20_v18 = vld [vmem:[%s506_s1 + $0x30] sm:$0xff]  ;;  %v19_v20 = vld [vmem:[%s506_s1 + $0x28] sm:$0xff] }
   0xd   :  { %v36_v19 = vld [vmem:[%s506_s1 + $0xb0] sm:$0xff]  ;;  %v35_v21 = vld [vmem:[%s506_s1 + $0xa8] sm:$0xff]  ;;  %v18_v22 = vld [vmem:[%s506_s1 + $0x20] sm:$0xff] }
   0xe   :  { %256 = vmatpush.xpose.msk.msra.mxu2 %vm46_vm0, %v26_v6  ;;  %220 = vmatpush.xpose.msk.msra.mxu0 %vm46_vm0, %v26_v6  ;;  %v34_v23 = vld [vmem:[%s506_s1 + $0xa0] sm:$0xff]  ;;  %v17_v24 = vld [vmem:[%s506_s1 + $0x18] sm:$0xff]  ;;  %v16_v26 = vld [vmem:[%s506_s1 + $0x10] sm:$0xff] }
   0xf   :  { %272 = vmatpush.xpose.msk.msra.mxu3 %vm46_vm0, %v42_v7  ;;  %238 = vmatpush.xpose.msk.msra.mxu1 %vm46_vm0, %v42_v7  ;;  %v33_v25 = vld [vmem:[%s506_s1 + $0x98] sm:$0xff]  ;;  %v32_v27 = vld [vmem:[%s506_s1 + $0x90] sm:$0xff]  ;;  %v15_v28 = vld [vmem:[%s506_s1 + $0x8] sm:$0xff] }
  0x10   :  { %v31_v29 = vld [vmem:[%s506_s1 + $0x88] sm:$0xff]  ;;  %v14_v30 = vld [vmem:[%s506_s1] sm:$0xff] }
  0x11   :  { %v30_v31 = vld [vmem:[%s506_s1 + $0x80] sm:$0xff]  ;;  %v13_v32 = vld [vmem:[%s505_s0 + $0x8] sm:$0xff]  ;;  %s314_s1 = smov [#allocation2]  }
  0x12   :  { %257 = vmatpush.xpose.msk.msra.mxu2 %vm46_vm0, %v25_v8  ;;  %221 = vmatpush.xpose.msk.msra.mxu0 %vm46_vm0, %v25_v8  ;;  %v12_v33 = vld [vmem:[%s505_s0] sm:$0xff]  ;;  %s203_s21 = sshll.u32 %s314_s1, 4  ;;  %s315_s0 = smov 256   ;;  %s204_s21 = int_to_ptr.vmem [resolvable:$true] %s203_s21 }
  0x13   :  { %273 = vmatpush.xpose.msk.msra.mxu3 %vm46_vm0, %v41_v9  ;;  %239 = vmatpush.xpose.msk.msra.mxu1 %vm46_vm0, %v41_v9 }
  0x16   :  { %258 = vmatpush.xpose.msk.msra.mxu2 %vm46_vm0, %v24_v10  ;;  %222 = vmatpush.xpose.msk.msra.mxu0 %vm46_vm0, %v24_v10 }
  0x17   :  { %274 = vmatpush.xpose.msk.msra.mxu3 %vm46_vm0, %v40_v11  ;;  %240 = vmatpush.xpose.msk.msra.mxu1 %vm46_vm0, %v40_v11 }
  0x1a   :  { %259 = vmatpush.xpose.msk.msra.mxu2 %vm46_vm0, %v23_v12  ;;  %223 = vmatpush.xpose.msk.msra.mxu0 %vm46_vm0, %v23_v12 }
  0x1b   :  { %275 = vmatpush.xpose.msk.msra.mxu3 %vm46_vm0, %v39_v13  ;;  %241 = vmatpush.xpose.msk.msra.mxu1 %vm46_vm0, %v39_v13 }
  0x1e   :  { %260 = vmatpush.xpose.msk.msra.mxu2 %vm46_vm0, %v22_v14  ;;  %224 = vmatpush.xpose.msk.msra.mxu0 %vm46_vm0, %v22_v14 }
  0x1f   :  { %276 = vmatpush.xpose.msk.msra.mxu3 %vm46_vm0, %v38_v15  ;;  %242 = vmatpush.xpose.msk.msra.mxu1 %vm46_vm0, %v38_v15 }
  0x22   :  { %261 = vmatpush.xpose.msk.msra.mxu2 %vm46_vm0, %v21_v16  ;;  %225 = vmatpush.xpose.msk.msra.mxu0 %vm46_vm0, %v21_v16 }
  0x23   :  { %277 = vmatpush.xpose.msk.msra.mxu3 %vm46_vm0, %v37_v17  ;;  %243 = vmatpush.xpose.msk.msra.mxu1 %vm46_vm0, %v37_v17 }
  0x26   :  { %262 = vmatpush.xpose.msk.msra.mxu2 %vm46_vm0, %v20_v18  ;;  %226 = vmatpush.xpose.msk.msra.mxu0 %vm46_vm0, %v20_v18 }
  0x27   :  { %278 = vmatpush.xpose.msk.msra.mxu3 %vm46_vm0, %v36_v19  ;;  %244 = vmatpush.xpose.msk.msra.mxu1 %vm46_vm0, %v36_v19 }
  0x2a   :  { %263 = vmatpush.xpose.msk.msra.mxu2 %vm46_vm0, %v19_v20  ;;  %227 = vmatpush.xpose.msk.msra.mxu0 %vm46_vm0, %v19_v20 }
  0x2b   :  { %279 = vmatpush.xpose.msk.msra.mxu3 %vm46_vm0, %v35_v21  ;;  %245 = vmatpush.xpose.msk.msra.mxu1 %vm46_vm0, %v35_v21 }
  0x2e   :  { %264 = vmatpush.xpose.msk.msra.mxu2 %vm46_vm0, %v18_v22  ;;  %228 = vmatpush.xpose.msk.msra.mxu0 %vm46_vm0, %v18_v22 }
  0x2f   :  { %280 = vmatpush.xpose.msk.msra.mxu3 %vm46_vm0, %v34_v23  ;;  %246 = vmatpush.xpose.msk.msra.mxu1 %vm46_vm0, %v34_v23 }
  0x32   :  { %265 = vmatpush.xpose.msk.msra.mxu2 %vm46_vm0, %v17_v24  ;;  %229 = vmatpush.xpose.msk.msra.mxu0 %vm46_vm0, %v17_v24 }
  0x33   :  { %281 = vmatpush.xpose.msk.msra.mxu3 %vm46_vm0, %v33_v25  ;;  %247 = vmatpush.xpose.msk.msra.mxu1 %vm46_vm0, %v33_v25 }
  0x36   :  { %266 = vmatpush.xpose.msk.msra.mxu2 %vm46_vm0, %v16_v26  ;;  %230 = vmatpush.xpose.msk.msra.mxu0 %vm46_vm0, %v16_v26 }
  0x37   :  { %282 = vmatpush.xpose.msk.msra.mxu3 %vm46_vm0, %v32_v27  ;;  %248 = vmatpush.xpose.msk.msra.mxu1 %vm46_vm0, %v32_v27 }
  0x3a   :  { %267 = vmatpush.xpose.msk.msra.mxu2 %vm46_vm0, %v15_v28  ;;  %231 = vmatpush.xpose.msk.msra.mxu0 %vm46_vm0, %v15_v28 }
  0x3b   :  { %283 = vmatpush.xpose.msk.msra.mxu3 %vm46_vm0, %v31_v29  ;;  %249 = vmatpush.xpose.msk.msra.mxu1 %vm46_vm0, %v31_v29 }
  0x3e   :  { %268 = vmatpush.xpose.msk.msra.mxu2 %vm46_vm0, %v14_v30  ;;  %232 = vmatpush.xpose.msk.msra.mxu0 %vm46_vm0, %v14_v30 }
  0x3f   :  { %284 = vmatpush.xpose.msk.msra.mxu3 %vm46_vm0, %v30_v31  ;;  %250 = vmatpush.xpose.msk.msra.mxu1 %vm46_vm0, %v30_v31 }
  0x41   :  { %234 = vmatmul.msk.f32.vlgmr.msra.gmra.mxu2 %vm46_vm0, %v13_v32  ;;  %233 = vmatmul.msk.f32.vlgmr.msra.gmra.mxu0 %vm46_vm0, %v12_v33 }
  0x42   :  { %252 = vmatmul.msk.f32.vlgmr.msra.gmra.mxu3 %vm46_vm0, %v13_v32  ;;  %251 = vmatmul.msk.f32.vlgmr.msra.gmra.mxu1 %vm46_vm0, %v12_v33 }
  0xbe   :  { %v166_v34 = vpop.f32.mrf.mxu0 }
  0xbf   :  { %v189_v35 = vpop.f32.mrf.mxu1  ;;  %195 = vst [vmem:[#allocation2] sm:$0xff] %v166_v34 }
  0xc0   :  { %196 = vst [vmem:[#allocation2 + $0x8] sm:$0xff] %v189_v35 }
  0xc4   :  { %v169_v36 = vpop.f32.mrf.mxu2 }
  0xc5   :  { %v192_v37 = vpop.f32.mrf.mxu3  ;;  %197 = vst [vmem:[#allocation2 + $0x10] sm:$0xff] %v169_v36 }
  0xc6   :  { %198 = vst [vmem:[#allocation2 + $0x18] sm:$0xff] %v192_v37 }
  0xc7   :  { %211 = dma.vmem_to_hbm [thread:$0]  %s204_s21, 512, %s206_s24, [#allocation3], %s315_s0, %s315_s0, %s316_s25  }
  0xc8   :  { %312 = dma.done.wait [#allocation3], 512  }
  0xc9   :  { %313 = vsyncadd [#allocation3], 4294966784 }
  0xca   :  { %216 = vsyncpa [#allocation3], 1 }

</bundles_post_ra>
